<compile_context>
chip_gen: v7x
topology: tpu7x:2x2x1
jax: 0.10.0
libtpu: 0.0.40
codegen_flags: <defaults>
</compile_context>

<pallas_src>
import jax
import jax.numpy as jnp
from jax.experimental import pallas as pl
from jax.experimental.pallas import tpu as pltpu

LANE = 128
VMEM_LIMIT = 32 * 1024 * 1024


def _round_up(x, m):
    return ((x + m - 1) // m) * m


# ---------------------------------------------------------------------------
# Pass 1 kernel: fused backbone conv (im2col matmul) + ReLU
#                + first projection 1x1 matmul + per-tile BN partial stats.
#   p_ref:   (K, T)   im2col patches, channels-leading (T = tile_hw pixels)
#   wbb_ref: (Cf, K)  backbone conv weight (transposed)      [grid-invariant]
#   w1_ref:  (Cf, Cf) first 1x1 projection weight (transposed)
#   y1_ref:  (Cf, T)  first-projection output tile
#   stats_ref: (Cf, 2) per-tile [sum, sum of squares] in f32
# ---------------------------------------------------------------------------
def _pass1_kernel(p_ref, wbb_ref, w1_ref, y1_ref, stats_ref):
    feat = jnp.dot(wbb_ref[...], p_ref[...],
                   preferred_element_type=jnp.float32)          # 3x3 conv (im2col)
    feat = jnp.maximum(feat, 0.0)                               # backbone ReLU
    y1 = jnp.dot(w1_ref[...], feat.astype(w1_ref.dtype),
                 preferred_element_type=jnp.float32)            # 1x1 conv, no bias
    y1_ref[...] = y1.astype(y1_ref.dtype)
    stats_ref[:, 0:1] = jnp.sum(y1, axis=1, keepdims=True)      # direct stores,
    stats_ref[:, 1:2] = jnp.sum(y1 * y1, axis=1, keepdims=True)  # no concatenate


def _pass1(patches, wbb_t, w1_t, *, tile_hw):
    N, K, HWp = patches.shape
    Cf = wbb_t.shape[0]
    G = HWp // tile_hw
    item = jnp.dtype(patches.dtype).itemsize
    flops = 2 * N * HWp * Cf * (K + Cf)
    bytes_accessed = (N * K * HWp * item + N * Cf * HWp * item
                      + N * G * Cf * 2 * 4 + (Cf * K + Cf * Cf) * item)
    return pl.pallas_call(
        _pass1_kernel,
        out_shape=(jax.ShapeDtypeStruct((N, Cf, HWp), patches.dtype),
                   jax.ShapeDtypeStruct((N, G, Cf, 2), jnp.float32)),
        grid=(N, G),
        in_specs=[
            pl.BlockSpec((None, K, tile_hw), lambda n, g: (n, 0, g)),
            pl.BlockSpec((Cf, K), lambda n, g: (0, 0)),    # weights held resident
            pl.BlockSpec((Cf, Cf), lambda n, g: (0, 0)),
        ],
        out_specs=(
            pl.BlockSpec((None, Cf, tile_hw), lambda n, g: (n, 0, g)),
            pl.BlockSpec((None, None, Cf, 2), lambda n, g: (n, g, 0, 0)),
        ),
        compiler_params=pltpu.CompilerParams(
            dimension_semantics=("parallel", "parallel"),
            vmem_limit_bytes=VMEM_LIMIT),
        cost_estimate=pl.CostEstimate(flops=flops, transcendentals=0,
                                      bytes_accessed=bytes_accessed),
    )(patches, wbb_t, w1_t)


# ---------------------------------------------------------------------------
# Pass 2 kernel: BatchNorm (pre-folded scale/shift) + ReLU + final 1x1 conv.
#   y1_ref: (Cf, T)   scale/shift: (Cf, 1)   w2_ref: (Co, Cf)   b2_ref: (Co, 1)
#   out_ref: (Co, T)  -- written straight into the (N, Co, H*W) NCHW output.
# ---------------------------------------------------------------------------
def _pass2_kernel(y1_ref, scale_ref, shift_ref, w2_ref, b2_ref, out_ref):
    y1 = y1_ref[...].astype(jnp.float32)                              # (Cf, T)
    h = jnp.maximum(y1 * scale_ref[...] + shift_ref[...], 0.0)        # BN + ReLU
    out = jnp.dot(w2_ref[...], h.astype(w2_ref.dtype),
                  preferred_element_type=jnp.float32)                 # 1x1 conv
    out_ref[...] = (out + b2_ref[...]).astype(out_ref.dtype)


def _pass2(y1, scale, shift, w2_t, b2_c, *, tile_hw):
    N, Cf, HWp = y1.shape
    Co = w2_t.shape[0]
    G = HWp // tile_hw
    item = jnp.dtype(y1.dtype).itemsize
    flops = 2 * N * HWp * Cf * Co
    bytes_accessed = (N * Cf * HWp * item + N * Co * HWp * 4
                      + Co * Cf * item + (Co + 2 * Cf) * 4)
    return pl.pallas_call(
        _pass2_kernel,
        out_shape=jax.ShapeDtypeStruct((N, Co, HWp), jnp.float32),
        grid=(N, G),
        in_specs=[
            pl.BlockSpec((None, Cf, tile_hw), lambda n, g: (n, 0, g)),
            pl.BlockSpec((Cf, 1), lambda n, g: (0, 0)),   # grid-invariant vectors
            pl.BlockSpec((Cf, 1), lambda n, g: (0, 0)),
            pl.BlockSpec((Co, Cf), lambda n, g: (0, 0)),  # W2 held resident
            pl.BlockSpec((Co, 1), lambda n, g: (0, 0)),
        ],
        out_specs=pl.BlockSpec((None, Co, tile_hw), lambda n, g: (n, 0, g)),
        compiler_params=pltpu.CompilerParams(
            dimension_semantics=("parallel", "parallel"),
            vmem_limit_bytes=VMEM_LIMIT),
        cost_estimate=pl.CostEstimate(flops=flops, transcendentals=0,
                                      bytes_accessed=bytes_accessed),
    )(y1, scale, shift, w2_t, b2_c)


# ---------------------------------------------------------------------------
# Encoder forward (JAX glue around the two Pallas passes)
# ---------------------------------------------------------------------------
def encoder_forward(x_nchw, params, *, tile_hw=2048, matmul_dtype=jnp.bfloat16):
    w_bb, w1, gamma, beta, w2, b2 = params
    N, Cin, H, W = x_nchw.shape
    Cf = w_bb.shape[-1]
    Co = w2.shape[1]
    K = 9 * Cin
    HW = H * W
    M = N * HW                                   # true BN sample count

    # Lane-dense tile over H*W, clamped to the image size.
    t = min(_round_up(tile_hw, LANE), _round_up(HW, LANE))
    HWp = _round_up(HW, t)

    # --- im2col glue, channels-leading (NCHW native -> no layout transpose) --
    # Padded spatial columns are exact zeros: they add nothing to BN sums and
    # are sliced off at the end.
    # TODO(synk): replace the JAX-side im2col materialization with in-kernel
    # 9-tap shifted-matmul accumulation over a haloed NCHW row block.
    xp = jnp.pad(x_nchw, ((0, 0), (0, 0), (1, 1), (1, 1)))
    taps = [xp[:, :, dy:dy + H, dx:dx + W] for dy in range(3) for dx in range(3)]
    patches = jnp.stack(taps, axis=1).reshape(N, K, HW)          # (N, 9*Cin, HW)
    patches = jnp.pad(patches, ((0, 0), (0, 0), (0, HWp - HW))).astype(matmul_dtype)

    wbb_t = w_bb.reshape(K, Cf).T.astype(matmul_dtype)           # (Cf, K)
    w1_t = w1.T.astype(matmul_dtype)                             # (Cf, Cf)
    w2_t = w2.T.astype(matmul_dtype)                             # (Co, Cf)
    b2_c = b2.reshape(Co, 1).astype(jnp.float32)                 # (Co, 1)

    # --- Pallas pass 1: conv + ReLU + proj matmul #1 + BN partial sums -------
    y1, stats = _pass1(patches, wbb_t, w1_t, tile_hw=t)

    # --- tiny cross-tile BN reduction + affine fold (training-mode BN:
    #     batch statistics, biased variance, eps=1e-5), all in f32.
    #     Note (bf16 path): stats come from the pre-cast f32 y1 while pass 2
    #     applies the affine to the bf16-rounded y1 — tiny, documented skew.
    # TODO(synk): for very large M, switch to a centered / Welford-style
    # cross-tile combine to avoid E[x^2]-E[x]^2 cancellation.
    tot = jnp.sum(stats, axis=(0, 1))                            # (Cf, 2)
    mean = tot[:, 0] / M
    var = tot[:, 1] / M - mean * mean
    scale = gamma.reshape(Cf).astype(jnp.float32) * jax.lax.rsqrt(var + 1e-5)
    shift = beta.reshape(Cf).astype(jnp.float32) - mean * scale
    scale = scale.reshape(Cf, 1)
    shift = shift.reshape(Cf, 1)

    # --- Pallas pass 2: BN + ReLU + final 1x1 conv (+bias), direct to NCHW ---
    out = _pass2(y1, scale, shift, w2_t, b2_c, tile_hw=t)        # (N, Co, HWp)

    if HWp != HW:
        out = out[:, :, :HW]
    return out.reshape(N, Co, H, W)                              # NCHW, no transpose


# ---------------------------------------------------------------------------
# Pure-JAX reference (f32) for the in-script correctness check
# ---------------------------------------------------------------------------
def encoder_reference(x_nchw, params):
    w_bb, w1, gamma, beta, w2, b2 = params
    N, Cin, H, W = x_nchw.shape
    Cf = w_bb.shape[-1]
    x = jnp.transpose(x_nchw, (0, 2, 3, 1))
    feat = jax.lax.conv_general_dilated(
        x, w_bb, window_strides=(1, 1), padding="SAME",
        dimension_numbers=("NHWC", "HWIO", "NHWC"))
    feat = jnp.maximum(feat, 0.0).reshape(N * H * W, Cf)
    y1 = feat @ w1
    mean = y1.mean(axis=0, keepdims=True)
    var = ((y1 - mean) ** 2).mean(axis=0, keepdims=True)
    h = jnp.maximum((y1 - mean) / jnp.sqrt(var + 1e-5) * gamma.reshape(-1)
                    + beta.reshape(-1), 0.0)
    out = h @ w2 + b2.reshape(-1)
    return jnp.transpose(out.reshape(N, H, W, -1), (0, 3, 1, 2))


if __name__ == "__main__":
    key = jax.random.PRNGKey(0)
    k_x, k_bb, k_w1, k_w2, k_b2 = jax.random.split(key, 5)

    # Small shapes consistent with the module's forward
    N, Cin, H, W = 2, 4, 16, 16
    Cf, Co = 32, 256          # projection_nin = Cf (last backbone conv out_channels)

    x = jax.random.normal(k_x, (N, Cin, H, W), dtype=jnp.float32)

    # Deterministic synthetic parameters (HWIO conv weight; BN defaults)
    w_bb = 0.1 * jax.random.normal(k_bb, (3, 3, Cin, Cf), dtype=jnp.float32)
    w1 = 0.1 * jax.random.normal(k_w1, (Cf, Cf), dtype=jnp.float32)
    gamma = jnp.ones((Cf,), dtype=jnp.float32)
    beta = jnp.zeros((Cf,), dtype=jnp.float32)
    w2 = 0.1 * jax.random.normal(k_w2, (Cf, Co), dtype=jnp.float32)
    b2 = 0.01 * jax.random.normal(k_b2, (Co,), dtype=jnp.float32)
    params = (w_bb, w1, gamma, beta, w2, b2)

    ref = jax.block_until_ready(encoder_reference(x, params))

    # f32 MXU-input path: tight check vs reference
    out_f32 = jax.block_until_ready(
        encoder_forward(x, params, matmul_dtype=jnp.float32))
    assert out_f32.shape == (N, Co, H, W), out_f32.shape
    assert jnp.allclose(out_f32, ref, atol=1e-4, rtol=1e-4), "f32 mismatch vs reference"

    # Default path: bf16 MXU inputs on all generations (f32 accumulation / BN math)
    out_bf16 = jax.block_until_ready(encoder_forward(x, params))
    assert out_bf16.shape == (N, Co, H, W)
    assert jnp.allclose(out_bf16, ref, atol=1e-1, rtol=1e-1), "bf16 mismatch vs reference"

    print("KERNEL_OK")
</pallas_src>

<mosaic_0001>
module attributes {stable_mosaic.version = 11 : i64} {
  func.func @_pass1_kernel(%arg0: i32, %arg1: i32, %arg2: memref<1x36x256xf32, #tpu.memory_space<vmem>>, %arg3: memref<32x36xf32, #tpu.memory_space<vmem>>, %arg4: memref<32x32xf32, #tpu.memory_space<vmem>>, %arg5: memref<1x32x256xf32, #tpu.memory_space<vmem>>, %arg6: memref<1x1x32x2xf32, #tpu.memory_space<vmem>>) attributes {dimension_semantics = [#tpu.dimension_semantics<parallel>, #tpu.dimension_semantics<parallel>], iteration_bounds = array<i64: 2, 1>, scalar_prefetch = 0 : i64, scratch_operands = 0 : i64, tpu.core_type = #tpu.core_type<tc>, window_params = [{transform_indices = @transform_0, window_bounds = array<i64: 1, 36, 256>}, {pipeline_mode = #tpu.pipeline_mode<synchronous>, transform_indices = @transform_1, window_bounds = array<i64: 32, 36>}, {pipeline_mode = #tpu.pipeline_mode<synchronous>, transform_indices = @transform_2, window_bounds = array<i64: 32, 32>}, {transform_indices = @transform_3, window_bounds = array<i64: 1, 32, 256>}, {transform_indices = @transform_4, window_bounds = array<i64: 1, 1, 32, 2>}]} {
    %c0 = arith.constant 0 : index
    %c0_0 = arith.constant 0 : index
    %0 = vector.load %arg3[%c0, %c0_0] : memref<32x36xf32, #tpu.memory_space<vmem>>, vector<32x36xf32>
    %c0_1 = arith.constant 0 : index
    %c0_2 = arith.constant 0 : index
    %c0_3 = arith.constant 0 : index
    %1 = vector.load %arg2[%c0_1, %c0_2, %c0_3] : memref<1x36x256xf32, #tpu.memory_space<vmem>>, vector<1x36x256xf32>
    %2 = vector.shape_cast %1 : vector<1x36x256xf32> to vector<36x256xf32>
    %cst = arith.constant dense<0.000000e+00> : vector<32x256xf32>
    %3 = tpu.matmul %0, %2, %cst {dimension_numbers = #tpu.dot_dimension_numbers<[1], [0], [0], [1], [0, 0, 1, 1], [], []>} : vector<32x36xf32>, vector<36x256xf32>, vector<32x256xf32> -> vector<32x256xf32>
    %cst_4 = arith.constant 0.000000e+00 : f32
    %4 = vector.broadcast %cst_4 : f32 to vector<32x256xf32>
    %5 = arith.maximumf %3, %4 : vector<32x256xf32>
    %c0_5 = arith.constant 0 : index
    %c0_6 = arith.constant 0 : index
    %6 = vector.load %arg4[%c0_5, %c0_6] : memref<32x32xf32, #tpu.memory_space<vmem>>, vector<32x32xf32>
    %cst_7 = arith.constant dense<0.000000e+00> : vector<32x256xf32>
    %7 = tpu.matmul %6, %5, %cst_7 {dimension_numbers = #tpu.dot_dimension_numbers<[1], [0], [0], [1], [0, 0, 1, 1], [], []>} : vector<32x32xf32>, vector<32x256xf32>, vector<32x256xf32> -> vector<32x256xf32>
    %c0_8 = arith.constant 0 : index
    %c0_9 = arith.constant 0 : index
    %c0_10 = arith.constant 0 : index
    %8 = vector.load %arg5[%c0_8, %c0_9, %c0_10] : memref<1x32x256xf32, #tpu.memory_space<vmem>>, vector<1x32x256xf32>
    %9 = vector.shape_cast %8 : vector<1x32x256xf32> to vector<32x256xf32>
    %10 = vector.shape_cast %7 : vector<32x256xf32> to vector<1x32x256xf32>
    tpu.vector_store %arg5[%c0_8, %c0_9, %c0_10], %10 {strides = array<i32>} : memref<1x32x256xf32, #tpu.memory_space<vmem>>, vector<1x32x256xf32>,
    %cst_11 = arith.constant dense<0.000000e+00> : vector<32xf32>
    %11 = vector.multi_reduction <add>, %7, %cst_11 [1] : vector<32x256xf32> to vector<32xf32>
    %12 = vector.shape_cast %11 : vector<32xf32> to vector<32x1xf32>
    %c0_12 = arith.constant 0 : index
    %c0_13 = arith.constant 0 : index
    %c0_14 = arith.constant 0 : index
    %c0_15 = arith.constant 0 : index
    %13 = vector.load %arg6[%c0_12, %c0_13, %c0_14, %c0_15] : memref<1x1x32x2xf32, #tpu.memory_space<vmem>>, vector<1x1x32x1xf32>
    %14 = vector.shape_cast %13 : vector<1x1x32x1xf32> to vector<32x1xf32>
    %15 = vector.shape_cast %12 : vector<32x1xf32> to vector<1x1x32x1xf32>
    tpu.vector_store %arg6[%c0_12, %c0_13, %c0_14, %c0_15], %15 {strides = array<i32>} : memref<1x1x32x2xf32, #tpu.memory_space<vmem>>, vector<1x1x32x1xf32>,
    %16 = arith.mulf %7, %7 : vector<32x256xf32>
    %cst_16 = arith.constant dense<0.000000e+00> : vector<32xf32>
    %17 = vector.multi_reduction <add>, %16, %cst_16 [1] : vector<32x256xf32> to vector<32xf32>
    %18 = vector.shape_cast %17 : vector<32xf32> to vector<32x1xf32>
    %c0_17 = arith.constant 0 : index
    %c0_18 = arith.constant 0 : index
    %c0_19 = arith.constant 0 : index
    %c1 = arith.constant 1 : index
    %19 = vector.load %arg6[%c0_17, %c0_18, %c0_19, %c1] : memref<1x1x32x2xf32, #tpu.memory_space<vmem>>, vector<1x1x32x1xf32>
    %20 = vector.shape_cast %19 : vector<1x1x32x1xf32> to vector<32x1xf32>
    %21 = vector.shape_cast %18 : vector<32x1xf32> to vector<1x1x32x1xf32>
    tpu.vector_store %arg6[%c0_17, %c0_18, %c0_19, %c1], %21 {strides = array<i32>} : memref<1x1x32x2xf32, #tpu.memory_space<vmem>>, vector<1x1x32x1xf32>,
    return
  }
  func.func @transform_0(%arg0: i32, %arg1: i32) -> (i32, i32, i32) {
    %c0_i32 = arith.constant 0 : i32
    %c0_i32_0 = arith.constant 0 : i32
    return %arg0, %c0_i32, %arg1 : i32, i32, i32
  }
  func.func @transform_1(%arg0: i32, %arg1: i32) -> (i32, i32) {
    %c0_i32 = arith.constant 0 : i32
    %c0_i32_0 = arith.constant 0 : i32
    %c0_i32_1 = arith.constant 0 : i32
    return %c0_i32, %c0_i32_0 : i32, i32
  }
  func.func @transform_2(%arg0: i32, %arg1: i32) -> (i32, i32) {
    %c0_i32 = arith.constant 0 : i32
    %c0_i32_0 = arith.constant 0 : i32
    %c0_i32_1 = arith.constant 0 : i32
    return %c0_i32, %c0_i32_0 : i32, i32
  }
  func.func @transform_3(%arg0: i32, %arg1: i32) -> (i32, i32, i32) {
    %c0_i32 = arith.constant 0 : i32
    %c0_i32_0 = arith.constant 0 : i32
    return %arg0, %c0_i32, %arg1 : i32, i32, i32
  }
  func.func @transform_4(%arg0: i32, %arg1: i32) -> (i32, i32, i32, i32) {
    %c0_i32 = arith.constant 0 : i32
    %c0_i32_0 = arith.constant 0 : i32
    %c0_i32_1 = arith.constant 0 : i32
    return %arg0, %arg1, %c0_i32, %c0_i32_0 : i32, i32, i32, i32
  }
}

</mosaic_0001>

<bundles_post_ra>
// kernel: tpu_custom_call.1
= control target key start
LH: loop header
LB: loop body
LE: loop exit
PB: predicated region body
PF: predicated region fallthrough
CT: control target
= control target key end

     0   :  { %10 = vsyncpa [#allocation3], 0  ;;  %s1064_s0 = inlined_call_operand.vmem [shape: f32[2,36,256], index: 0, kind: input, shape index: {}]   ;;  %s1065_s1 = inlined_call_operand.vmem [shape: f32[32,36], index: 1, kind: input, shape index: {}]   ;;  %s1066_s2 = inlined_call_operand.vmem [shape: f32[32,32], index: 2, kind: input, shape index: {}]   ;;  %s1067_s3 = inlined_call_operand.hbm [shape: f32[2,32,256], index: 3, kind: output, shape index: {0}]   ;;  %s1068_s4 = inlined_call_operand.vmem [shape: f32[2,1,32,2], index: 4, kind: output, shape index: {1}]  }
   0x1   :  { %12 = vsyncpa [#allocation3 + $0x1], 0  ;;  %s895_s15 = smov 0   ;;  %s897_s16 = smov 0  }
   0x2   :  { %s899_s17 = smov 0   ;;  %s901_s18 = smov 0  }
   0x3   :  { %s903_s19 = smov 0   ;;  %s905_s20 = smov 0  }
   0x4 LB: > { %s685_s21 = sadd.s32 4294967295, %s864_s20   ;;  %s686_s22 = sadd.s32 4294967294, %s864_s20   ;;  %s864_s20 = sphi %s905_s20, %s18_s20   ;;  %s860_s19 = sphi %s903_s19, %s1075_s19   ;;  %s856_s18 = sphi %s901_s18, %s1074_s18   ;;  %s852_s17 = sphi %s899_s17, %s1073_s17   ;;  %s848_s16 = sphi %s897_s16, %s1072_s16   ;;  %s844_s15 = sphi %s895_s15, %s1071_s15  }
   0x5   : > { %s30_s23 = sadd.s32 1, %s860_s19  ;;  %s109_s24 = sadd.s32 1, %s852_s17 }
   0x6   : > { %p32_p0 = scmp.ge.s32.totalorder %s30_s23, 2  ;;  %p119_p1 = scmp.ne.s32.totalorder %s852_s17, %s848_s16 }
   0x7   : > { %p120_p2 = scmp.eq.s32.totalorder %s685_s21, 1  ;;  %p125_p3 = scmp.ne.s32.totalorder %s848_s16, %s844_s15 }
   0x8   : > { %s1077_s23 = smov (%p32_p0, %s30_s23), 0  ;;  %p126_p5 = scmp.eq.s32.totalorder %s686_s22, 1 }
   0x9   : > { %p935_p4 = por %p120_p2, %p119_p1  ;;  %s104_s26 = ssub.s32 %s860_s19, %s1077_s23 }
   0xa   : > { %p689_p6 = scmp.ge.s32.totalorder %s864_s20, 1  ;;  %p107_p7 = scmp.eq.s32.totalorder %s104_s26, 0 }
   0xb   : > { %p942_p8 = por %p126_p5, %p125_p3  ;;  %p191_p9 = scmp.lt.s32.totalorder %s864_s20, 3 }
   0xc   : > { %s948_s28 = scalar_select %p107_p7, %s852_s17, %s109_s24  }
   0xd   : > { %p192_p10 = pnand %p689_p6, %p191_p9 }
   0xe   : > { %p231_p11 = scmp.lt.s32.totalorder (!%p192_p10), %s856_s18, 1  ;;  %v866_v0 = vmov (!%p192_p10), 0.0   ;;  %vm277_vm0 = vcmask (!%p192_p10), 1043456   ;;  %v250_v15 = vld [vmem:[%s1065_s1] sm:$0xff] (!%p192_p10)  ;;  %vm264_vm1 = vcmask (!%p192_p10), 293888   ;;  %v251_v16 = vld [vmem:[%s1065_s1 + $0x8] sm:$0xff] (!%p192_p10) }
   0xf   : > { %195 = sbr.rel (%p192_p10) target bundleno = 649 (0x289), region = 32  ;;  %348 = vmatprep.mubr.f32.mxu0 (!%p192_p10), %v866_v0  ;;  %462 = vmatprep.mubr.f32.mxu1 (!%p192_p10), %v866_v0  ;;  %v252_v17 = vld [vmem:[%s1065_s1 + $0x10] sm:$0xff] (!%p192_p10)  ;;  %v253_v18 = vld [vmem:[%s1065_s1 + $0x18] sm:$0xff] (!%p192_p10)  ;;  %v381_v39 = vld [vmem:[%s1066_s2] sm:$0xff] (!%p192_p10)  ;;  %vm385_vm2 = vcmask (!%p192_p10), 261120   ;;  %s216_s9 = sand.u32 (!%p192_p10), 1, %s848_s16  }
  0x10   : > { %v382_v40 = vld [vmem:[%s1066_s2 + $0x8] sm:$0xff] (!%p192_p10)  ;;  %v383_v41 = vld [vmem:[%s1066_s2 + $0x10] sm:$0xff] (!%p192_p10)  ;;  %v384_v42 = vld [vmem:[%s1066_s2 + $0x18] sm:$0xff] (!%p192_p10)  ;;  %s690_s10 = sshll.u32 (!%p192_p10), %s216_s9, 6  ;;  %s710_s12 = sshll.u32 (!%p192_p10), %s856_s18, 10 }
  0x11   : > { %s993_s11 = scalar_lea.vmem (!%p192_p10), [#allocation2], %s690_s10  ;;  %s1008_s22 = scalar_lea.hbm (!%p192_p10), %s1067_s3, %s710_s12 }
  0x12   : > { %s562_s13 = sshll.u32 (!%p192_p10), %s993_s11, 4  ;;  %s1014_s24 = scalar_lea.sflag (!%p192_p10), [#allocation3], %s216_s9  ;;  %s1010_s13 = int_to_ptr.vmem [resolvable:$true] %s562_s13 }
  0x13   : > { %s786_s26 = scalar_lea.vmem (!%p192_p10), %s1010_s13, 1024 }
  0x14   : > { %p787_p12 = scmp.ne.s32.totalorder (!%p192_p10), %s1010_s13, %s786_s26 }
  0x16   : > { %s954_s29 = scalar_select %p231_p11, %s856_s18, 1 }
  0x17   : > { %p788_p13 = pnand %p787_p12, %p935_p4  ;;  %s867_s18 = smov [#allocation2]  }
  0x18   : > { %s727_s30 = smul.u32 80, %s954_s29 }
  0x19   : > { %p789_p0 = pneg %p788_p13 }
  0x1a   : > { %s238_s7 = scalar_lea.vmem %s1064_s0, %s727_s30  ;;  %s790_s30 = sshll.u32 %s867_s18, 4  ;;  %s791_s30 = int_to_ptr.vmem [resolvable:$false] %s790_s30 }
  0x1b   : > { %v255_v1 = vld [vmem:[%s238_s7 + $0x8] sm:$0xff]  ;;  %v257_v2 = vld [vmem:[%s238_s7 + $0x18] sm:$0xff]  ;;  %v254_v3 = vld [vmem:[%s238_s7] sm:$0xff]  ;;  %s792_s5 = scalar_lea.vmem %s791_s30, 2048  ;;  %p793_p1 = scmp.lt.s32.totalorder %s1010_s13, %s791_s30 }
  0x1c   : > { %v711_v4 = vpack.c.bf16 %v257_v2, %v255_v1  ;;  %v256_v5 = vld [vmem:[%s238_s7 + $0x10] sm:$0xff]  ;;  %v259_v6 = vld [vmem:[%s238_s7 + $0x28] sm:$0xff]  ;;  %v261_v7 = vld [vmem:[%s238_s7 + $0x38] sm:$0xff]  ;;  %p794_p2 = scmp.lt.s32.totalorder %s792_s5, %s786_s26 }
  0x1d   : > { %v713_v8 = vpack.c.bf16 %v256_v5, %v254_v3  ;;  %v715_v9 = vpack.c.bf16 %v261_v7, %v259_v6  ;;  %v258_v10 = vld [vmem:[%s238_s7 + $0x20] sm:$0xff]  ;;  %v260_v11 = vld [vmem:[%s238_s7 + $0x30] sm:$0xff]  ;;  %v263_v13 = vld [vmem:[%s238_s7 + $0x48] sm:$0xf] }
  0x1e   : > { %712 = vmatprep.subr.bf16.mxu0 %v711_v4  ;;  %v717_v12 = vpack.c.bf16 %v260_v11, %v258_v10  ;;  %v262_v14 = vld [vmem:[%s238_s7 + $0x40] sm:$0xf]  ;;  %p795_p3 = por %p794_p2, %p793_p1 }
  0x1f   : > { %714 = vmatpush1.bf16.msra.mxu0 %v713_v8 }
  0x20   : > { %716 = vmatprep.subr.bf16.mxu0 %v715_v9  ;;  %p796_p5 = pnand %p795_p3, %p789_p0 }
  0x23   : > { %718 = vmatpush1.bf16.msra.mxu0 %v717_v12 }
  0x24   : > { %694 = vmatprep.subr.msk.mxu0 %vm277_vm0, %v263_v13 }
  0x27   : > { %695 = vmatpush1.msk.msra.mxu0 %vm277_vm0, %v262_v14 }
  0x28   : > { %696 = vmatmul.mubr.msk.f32.vlgmr.msra.gmra.mrb[0].mxu0 %vm264_vm1, %v250_v15 }
  0x29   : > { %354 = vmatprep.mubr.f32.mxu0 %v866_v0 }
  0x2c   : > { %697 = vmatmul.mubr.msk.f32.gmra.mrb[2].mxu0 %vm264_vm1, %v251_v16 }
  0x2d   : > { %360 = vmatprep.mubr.f32.mxu0 %v866_v0 }
  0x30   : > { %698 = vmatmul.mubr.msk.f32.gmra.mrb[4].mxu0 %vm264_vm1, %v252_v17 }
  0x31   : > { %366 = vmatprep.mubr.f32.mxu0 %v866_v0 }
  0x34   : > { %699 = vmatmul.mubr.msk.f32.gmra.mrb[6].mxu0 %vm264_vm1, %v253_v18 }
  0xfb   : > { %v350_v19 = vpop.f32.mrb[0].mxu0 }
  0xfc   : > { %v352_v20 = vpop.f32.mrb[1].mxu0  ;;  %v373_v22 = vmax.f32 %v350_v19, 0.0 }
  0xfd   : > { %v374_v25 = vmax.f32 %v352_v20, 0.0 }
  0xff   : > { %v356_v21 = vpop.f32.mrb[2].mxu0 }
 0x100   : > { %v375_v23 = vmax.f32 %v356_v21, 0.0  ;;  %v358_v24 = vpop.f32.mrb[3].mxu0 }
 0x101   : > { %v376_v26 = vmax.f32 %v358_v24, 0.0 }
 0x102   : > { %v721_v27 = vpack.c.bf16 %v375_v23, %v373_v22 }
 0x103   : > { %v362_v28 = vpop.f32.mrb[4].mxu0  ;;  %v719_v29 = vpack.c.bf16 %v376_v26, %v374_v25 }
 0x104   : > { %v364_v30 = vpop.f32.mrb[5].mxu0  ;;  %v377_v32 = vmax.f32 %v362_v28, 0.0 }
 0x105   : > { %720 = vmatprep.subr.bf16.mxu1 %v719_v29  ;;  %v378_v35 = vmax.f32 %v364_v30, 0.0 }
 0x106   : > { %722 = vmatpush1.bf16.msra.mxu1 %v721_v27 }
 0x107   : > { %v368_v31 = vpop.f32.mrb[6].mxu0 }
 0x108   : > { %v379_v33 = vmax.f32 %v368_v31, 0.0  ;;  %v370_v34 = vpop.f32.mrb[7].mxu0 }
 0x109   : > { %v380_v36 = vmax.f32 %v370_v34, 0.0 }
 0x10a   : > { %v725_v37 = vpack.c.bf16 %v379_v33, %v377_v32 }
 0x10b   : > { %v723_v38 = vpack.c.bf16 %v380_v36, %v378_v35 }
 0x10d   : > { %724 = vmatprep.subr.bf16.mxu1 %v723_v38 }
 0x10e   : > { %726 = vmatpush1.bf16.msra.mxu1 %v725_v37 }
 0x111   : > { %700 = vmatmul.mubr.msk.f32.vlgmr.msra.gmra.mrb[0].mxu1 %vm385_vm2, %v381_v39 }
 0x112   : > { %468 = vmatprep.mubr.f32.mxu1 %v866_v0 }
 0x115   : > { %701 = vmatmul.mubr.msk.f32.gmra.mrb[2].mxu1 %vm385_vm2, %v382_v40 }
 0x116   : > { %474 = vmatprep.mubr.f32.mxu1 %v866_v0 }
 0x119   : > { %702 = vmatmul.mubr.msk.f32.gmra.mrb[4].mxu1 %vm385_vm2, %v383_v41 }
 0x11a   : > { %480 = vmatprep.mubr.f32.mxu1 %v866_v0 }
 0x11d   : > { %703 = vmatmul.mubr.msk.f32.gmra.mrb[6].mxu1 %vm385_vm2, %v384_v42 }
 0x1e4   : > { %v464_v43 = vpop.f32.mrb[0].mxu1 }
 0x1e5   : > { %487 = vst [vmem:[%s993_s11] sm:$0xff] %v464_v43  ;;  %v466_v44 = vpop.f32.mrb[1].mxu1  ;;  %v512_v45 = vmul.f32 %v464_v43, %v464_v43 }
 0x1e6   : > { %488 = vst [vmem:[%s993_s11 + $0x8] sm:$0xff] %v466_v44  ;;  %v495_v46 = vadd.f32 %v466_v44, %v464_v43  ;;  %v513_v47 = vmul.f32 %v466_v44, %v466_v44 }
 0x1e8   : > { %496 = vadd.xlane.f32.xlu0 %v495_v46  ;;  %v470_v48 = vpop.f32.mrb[2].mxu1  ;;  %v520_v49 = vadd.f32 %v513_v47, %v512_v45 }
 0x1e9   : > { %489 = vst [vmem:[%s993_s11 + $0x10] sm:$0xff] %v470_v48  ;;  %v472_v50 = vpop.f32.mrb[3].mxu1  ;;  %v514_v51 = vmul.f32 %v470_v48, %v470_v48 }
 0x1ea   : > { %490 = vst [vmem:[%s993_s11 + $0x18] sm:$0xff] %v472_v50  ;;  %v515_v52 = vmul.f32 %v472_v50, %v472_v50  ;;  %v498_v53 = vadd.f32 %v472_v50, %v470_v48 }
 0x1ec   : > { %521 = vadd.xlane.f32.xlu0 %v520_v49  ;;  %v476_v54 = vpop.f32.mrb[4].mxu1  ;;  %v523_v55 = vadd.f32 %v515_v52, %v514_v51 }
 0x1ed   : > { %491 = vst [vmem:[%s993_s11 + $0x20] sm:$0xff] %v476_v54  ;;  %v478_v56 = vpop.f32.mrb[5].mxu1  ;;  %v516_v57 = vmul.f32 %v476_v54, %v476_v54 }
 0x1ee   : > { %524 = vadd.xlane.f32.xlu1 %v523_v55  ;;  %492 = vst [vmem:[%s993_s11 + $0x28] sm:$0xff] %v478_v56  ;;  %v501_v58 = vadd.f32 %v478_v56, %v476_v54  ;;  %v517_v59 = vmul.f32 %v478_v56, %v478_v56 }
 0x1f0   : > { %499 = vadd.xlane.f32.xlu0 %v498_v53  ;;  %v482_v60 = vpop.f32.mrb[6].mxu1  ;;  %v526_v61 = vadd.f32 %v517_v59, %v516_v57 }
 0x1f1   : > { %493 = vst [vmem:[%s993_s11 + $0x30] sm:$0xff] %v482_v60  ;;  %v484_v62 = vpop.f32.mrb[7].mxu1  ;;  %v518_v63 = vmul.f32 %v482_v60, %v482_v60 }
 0x1f2   : > { %502 = vadd.xlane.f32.xlu1 %v501_v58  ;;  %494 = vst [vmem:[%s993_s11 + $0x38] sm:$0xff] %v484_v62  ;;  %v519_v0 = vmul.f32 %v484_v62, %v484_v62  ;;  %v504_v1 = vadd.f32 %v484_v62, %v482_v60 }
 0x1f4   : > { %527 = vadd.xlane.f32.xlu0 %v526_v61  ;;  %v529_v2 = vadd.f32 %v519_v0, %v518_v63 }
 0x1f6   : > { %505 = vadd.xlane.f32.xlu1 %v504_v1 }
 0x1fa   : > { %530 = vadd.xlane.f32.xlu1 %v529_v2 }
 0x1fb   : > { %799 = shalt.err (!%p796_p5)
}
 0x1fc   : > { %s800_s6 = scalar_lea.hbm %s1008_s22, 1024  ;;  %s804_s9 = scalar_lea.hbm %s1067_s3, 2048 }
 0x1fd   : > { %p801_p6 = scmp.ne.s32.totalorder %s1008_s22, %s800_s6  ;;  %p805_p10 = scmp.lt.u32.totalorder %s1008_s22, %s1067_s3 }
 0x1fe   : > { %p806_p11 = scmp.lt.u32.totalorder %s804_s9, %s800_s6  ;;  %p808_p13 = scmp.lt.u32.totalorder %s800_s6, %s1008_s22 }
 0x1ff   : > { %p802_p7 = pnand %p801_p6, %p935_p4 }
 0x200   : > { %p807_p12 = por %p806_p11, %p805_p10 }
 0x201   : > { %p803_p9 = pneg %p802_p7 }
 0x202   : > { %p809_p0 = por %p808_p13, %p807_p12 }
 0x204   : > { %p810_p1 = pnand %p809_p0, %p803_p9 }
 0x206   : > { %813 = shalt.err (!%p810_p1)
}
 0x207   : > { %s868_s12 = smov 256   ;;  %s869_s14 = smov 16   ;;  %vm507_vm3 = vcmask 7168   ;;  %vm532_vm4 = vcmask 15368  }
 0x208   : > { %728 = dma.vmem_to_hbm [thread:$0]  (%p935_p4), %s1010_s13, 1024, %s1008_s22, %s1014_s24, %s868_s12, %s868_s12, %s869_s14  }
 0x209   : > { %s709_s21 = sshll.u32 %s954_s29, 5 }
 0x20a   : > { %s249_s30 = scalar_lea.vmem %s1068_s4, %s709_s21 }
 0x275   : > { %v497_v3 = vpop.xlane.xlu0 %496 }
 0x276   : > { %508 = vst.msk [vmem:[%s249_s30] sm:$0xff] %vm507_vm3, %v497_v3 }
 0x279   : > { %v522_v4 = vpop.xlane.xlu0 %521 }
 0x27a   : > { %533 = vst.msk [vmem:[%s249_s30] sm:$0xff] %vm532_vm4, %v522_v4 }
 0x27b   : > { %v525_v5 = vpop.xlane.xlu1 %524 }
 0x27d   : > { %v500_v6 = vpop.xlane.xlu0 %499 }
 0x27e   : > { %509 = vst.msk [vmem:[%s249_s30 + $0x8] sm:$0xff] %vm507_vm3, %v500_v6 }
 0x27f   : > { %534 = vst.msk [vmem:[%s249_s30 + $0x8] sm:$0xff] %vm532_vm4, %v525_v5  ;;  %v503_v7 = vpop.xlane.xlu1 %502 }
 0x280   : > { %510 = vst.msk [vmem:[%s249_s30 + $0x10] sm:$0xff] %vm507_vm3, %v503_v7 }
 0x281   : > { %v528_v8 = vpop.xlane.xlu0 %527 }
 0x282   : > { %535 = vst.msk [vmem:[%s249_s30 + $0x10] sm:$0xff] %vm532_vm4, %v528_v8 }
 0x283   : > { %v506_v9 = vpop.xlane.xlu1 %505 }
 0x284   : > { %511 = vst.msk [vmem:[%s249_s30 + $0x18] sm:$0xff] %vm507_vm3, %v506_v9 }
 0x287   : > { %v531_v10 = vpop.xlane.xlu1 %530 }
 0x288   : > { %536 = vst.msk [vmem:[%s249_s30 + $0x18] sm:$0xff] %vm532_vm4, %v531_v10 }
 0x289 PF: > { %p734_p4 = scmp.ge.s32.totalorder %s864_s20, 2  ;;  %s580_s25 = sand.u32 1, %s844_s15  }
 0x28a   : > { %s581_s29 = scalar_lea.sflag [#allocation3], %s580_s25 }
 0x28b   : > { %p731_p2 = pnand %p734_p4, %p942_p8 }
 0x28d   : > { %839 = dma.done.wait (!%p731_p2), %s581_s29, 1024  }
 0x28e   : > { %841 = vsyncadd (!%p731_p2), %s581_s29, 4294966272  ;;  %s18_s20 = sadd.s32 1, %s864_s20   ;;  %s1071_s15 = smov %s848_s16 }
 0x28f   : > { %p15_p3 = scmp.ge.s32.totalorder %s18_s20, 4   ;;  %s1072_s16 = smov %s852_s17 }
 0x290   : > { %s1073_s17 = smov %s948_s28  ;;  %s1074_s18 = smov %s860_s19 }
 0x291   : > { %s1075_s19 = smov %s1077_s23  ;;  %17 = sbr.rel (!%p15_p3) target bundleno = 4 (0x4), region = 79 }
 0x298   :  { %598 = vsyncpa [#allocation3], 1 }
 0x299   :  { %600 = vsyncpa [#allocation3 + $0x1], 1 }

</bundles_post_ra>
